<compile_context>
chip_gen: v5e
topology: v5e:2x2
jax: 0.10.0
libtpu: 0.0.40
codegen_flags: <defaults>
</compile_context>

<pallas_src>
import functools

import jax
import jax.numpy as jnp
from jax.experimental import pallas as pl
from jax.experimental.pallas import tpu as pltpu

LN_EPS = 1e-5          # torch.nn.LayerNorm default
_SUBLANE = 16          # row-tile granularity (safe for f32 and bf16)


def _round_up(x, m):
    return ((x + m - 1) // m) * m


def _vmem_config():
    """Generation-aware VMEM budget: ~100 MiB scoped limit on v5e/v6e (128 MiB
    physical), ~56 MiB on v7x (64 MiB physical) -- always with >= 8 MiB headroom."""
    cap = 64 * 1024 * 1024                       # conservative fallback (v7x-sized)
    try:
        info = pltpu.get_tpu_info()
        cap = int(getattr(info, "vmem_capacity_bytes", cap))
    except Exception:
        pass
    limit = max(32 * 1024 * 1024, min(cap - (8 << 20), 100 << 20))
    budget = int(0.8 * limit)
    return budget, limit


_VMEM_BUDGET, _VMEM_LIMIT = _vmem_config()


def _pick_block_rows(rows, d, h, itemsize, desired=1024):
    """Largest row tile (multiple of 16) whose pipeline fits the VMEM budget and
    leaves >= 2 grid steps (so both v7x TensorCores get work)."""
    if rows <= _SUBLANE:
        return rows                                        # block == full dim: always legal
    resident = (2 * d * h + 2 * h + 6 * d) * itemsize      # W1/W2 + biases/LN, single-buffered
    per_row = (3 * d * itemsize                            # x, up to 3 buffers
               + 2 * d * itemsize                          # out, double-buffered
               + 4 * (2 * h + 4 * d))                      # f32 temps: h, relu, z, zc, scale/out
    cand = min(_round_up(desired, _SUBLANE), _round_up(rows, _SUBLANE))
    while cand > _SUBLANE and resident + cand * per_row > _VMEM_BUDGET:
        cand -= _SUBLANE
    # Guarantee >= 2 grid steps when the row count allows it (v7x megacore balance).
    while cand > _SUBLANE and pl.cdiv(rows, cand) < 2:
        cand = max(_SUBLANE, _round_up(cand // 2, _SUBLANE))
    return cand


def _bottleneck_kernel(x_ref, w1_ref, b1_ref, w2_ref, b2_ref, g_ref, beta_ref,
                       o_ref, *, inv_d):
    """Fused: y = relu(x @ W1 + b1) @ W2 + b2 ; out = LayerNorm(y + x)."""
    # 1x1 Conv1d #1 (d_features -> d_hid) + ReLU.  Operands stay in the input
    # dtype (bf16 inputs feed the MXU as bf16); accumulate in f32.
    h = jnp.dot(x_ref[...], w1_ref[...], preferred_element_type=jnp.float32)
    h = jnp.maximum(h + b1_ref[...].astype(jnp.float32), 0.0)

    # 1x1 Conv1d #2 (d_hid -> d_features).
    y = jnp.dot(h.astype(w2_ref.dtype), w2_ref[...],
                preferred_element_type=jnp.float32)
    y = y + b2_ref[...].astype(jnp.float32)

    # dropout (identity in eval) + residual; re-read x so no f32 copy of the
    # input tile stays live across both matmuls.
    z = y + x_ref[...].astype(jnp.float32)

    # Two-pass LayerNorm over the true d_features width (numerically robust);
    # gamma folded into the rsqrt scale so the epilogue is mul + add only.
    mean = jnp.sum(z, axis=-1, keepdims=True) * inv_d
    zc = z - mean
    var = jnp.sum(zc * zc, axis=-1, keepdims=True) * inv_d
    scale = jax.lax.rsqrt(var + LN_EPS) * g_ref[...].astype(jnp.float32)
    out = zc * scale + beta_ref[...].astype(jnp.float32)
    o_ref[...] = out.astype(o_ref.dtype)


@functools.partial(jax.jit, static_argnames=("block_rows",))
def shuffle_bottleneck_v2_residual(features, w1, b1, w2, b2, gamma, beta,
                                   block_rows=None):
    """features: [B, C, D].  w1: [D, H], w2: [H, D] (pre-transposed from the
    Conv1d [out, in, 1] layout); b1: [1, H]; b2, gamma, beta: [1, D].
    Returns [B, C, D]."""
    B, C, D = features.shape
    H = w1.shape[1]
    rows = B * C
    itemsize = jnp.dtype(features.dtype).itemsize

    if block_rows is None:
        block_rows = _pick_block_rows(rows, D, H, itemsize)
    elif rows > _SUBLANE:
        block_rows = min(_round_up(block_rows, _SUBLANE), _round_up(rows, _SUBLANE))
    else:
        block_rows = rows
    n_steps = pl.cdiv(rows, block_rows)

    # x/out keep their true shapes in HBM: reshape is free, no pad/slice copies.
    x2d = features.reshape(rows, D)

    kernel = functools.partial(_bottleneck_kernel, inv_d=1.0 / D)

    # Constant index_map -> these never change across grid steps: one buffer.
    resident = dict(pipeline_mode=pl.Buffered(1))
    # Deep-buffer tiny x tiles so per-step DMA issue latency is hidden when the
    # step body is only a few microseconds (small-D regime).
    x_mode = (dict(pipeline_mode=pl.Buffered(3))
              if (n_steps >= 3 and block_rows * D * itemsize <= (2 << 20)) else {})

    cost = pl.CostEstimate(
        flops=4 * rows * D * H,                        # two matmuls
        transcendentals=rows,                          # one rsqrt per row
        bytes_accessed=(2 * rows * D * itemsize        # x in + out (true width, no padding)
                        + 2 * D * H * itemsize),       # weights
    )

    out2d = pl.pallas_call(
        kernel,
        out_shape=jax.ShapeDtypeStruct((rows, D), features.dtype),
        grid_spec=pltpu.PrefetchScalarGridSpec(
            num_scalar_prefetch=0,
            grid=(n_steps,),
            in_specs=[
                pl.BlockSpec((block_rows, D), lambda i: (i, 0), **x_mode),  # x rows
                pl.BlockSpec((D, H), lambda i: (0, 0), **resident),         # W1
                pl.BlockSpec((1, H), lambda i: (0, 0), **resident),         # b1
                pl.BlockSpec((H, D), lambda i: (0, 0), **resident),         # W2
                pl.BlockSpec((1, D), lambda i: (0, 0), **resident),         # b2
                pl.BlockSpec((1, D), lambda i: (0, 0), **resident),         # gamma
                pl.BlockSpec((1, D), lambda i: (0, 0), **resident),         # beta
            ],
            out_specs=pl.BlockSpec((block_rows, D), lambda i: (i, 0)),
        ),
        compiler_params=pltpu.CompilerParams(
            dimension_semantics=("parallel",),   # shards row tiles over v7x's 2 TCs
            vmem_limit_bytes=_VMEM_LIMIT,
        ),
        cost_estimate=cost,
    )(x2d, w1, b1, w2, b2, gamma, beta)

    return out2d.reshape(B, C, D)


def _reference(features, w1, b1, w2, b2, gamma, beta):
    """Pure-JAX reference mirroring the PyTorch forward (eval mode)."""
    x = features.astype(jnp.float32)
    h = jnp.maximum(jnp.einsum("bcd,dh->bch", x, w1.astype(jnp.float32)) + b1[0], 0.0)
    y = jnp.einsum("bch,hd->bcd", h, w2.astype(jnp.float32)) + b2[0]
    z = y + x
    mean = jnp.mean(z, axis=-1, keepdims=True)
    var = jnp.mean((z - mean) ** 2, axis=-1, keepdims=True)
    zn = (z - mean) * jax.lax.rsqrt(var + LN_EPS)
    return zn * gamma[0] + beta[0]


def _make_params(key, d_features, d_hid):
    kw1, kb1, kw2, kb2 = jax.random.split(key, 4)
    std1 = (2.0 / (d_features + d_hid)) ** 0.5
    std2 = (2.0 / (d_hid + d_features)) ** 0.5
    w1 = std1 * jax.random.normal(kw1, (d_features, d_hid), dtype=jnp.float32)
    w2 = std2 * jax.random.normal(kw2, (d_hid, d_features), dtype=jnp.float32)
    b1 = 0.01 * jax.random.normal(kb1, (1, d_hid), dtype=jnp.float32)
    b2 = 0.01 * jax.random.normal(kb2, (1, d_features), dtype=jnp.float32)
    gamma = jnp.ones((1, d_features), dtype=jnp.float32)   # LayerNorm defaults
    beta = jnp.zeros((1, d_features), dtype=jnp.float32)
    return w1, b1, w2, b2, gamma, beta


if __name__ == "__main__":
    key = jax.random.PRNGKey(0)
    kx1, kx2, kp = jax.random.split(key, 3)

    # Module config (mode='residual', d_hid defaults to d_features).
    d_features = 32
    d_hid = d_features
    w1, b1, w2, b2, gamma, beta = _make_params(kp, d_features, d_hid)

    # Case 1: canonical small demo shape, auto-picked row tile (single-step grid).
    feats1 = jax.random.normal(kx1, (2, 8, d_features), dtype=jnp.float32)
    out1 = jax.block_until_ready(
        shuffle_bottleneck_v2_residual(feats1, w1, b1, w2, b2, gamma, beta))
    ref1 = _reference(feats1, w1, b1, w2, b2, gamma, beta)
    assert out1.shape == feats1.shape
    assert jnp.allclose(out1, ref1, atol=1e-4, rtol=1e-4), "case1 mismatch vs reference"

    # Case 2: ragged row count (74) + explicit small tile -> 5-step pipelined grid
    # with a partial tail tile and 3-deep x buffering exercised.
    feats2 = jax.random.normal(kx2, (2, 37, d_features), dtype=jnp.float32)
    out2 = jax.block_until_ready(
        shuffle_bottleneck_v2_residual(feats2, w1, b1, w2, b2, gamma, beta,
                                       block_rows=16))
    ref2 = _reference(feats2, w1, b1, w2, b2, gamma, beta)
    assert out2.shape == feats2.shape
    assert jnp.allclose(out2, ref2, atol=1e-4, rtol=1e-4), "case2 mismatch vs reference"

    # Case 3: same ragged rows with the auto tile picker (>= 2 grid steps enforced).
    out3 = jax.block_until_ready(
        shuffle_bottleneck_v2_residual(feats2, w1, b1, w2, b2, gamma, beta))
    assert out3.shape == feats2.shape
    assert jnp.allclose(out3, ref2, atol=1e-4, rtol=1e-4), "case3 mismatch vs reference"

    print("KERNEL_OK")
</pallas_src>

<mosaic_0001>
module attributes {stable_mosaic.version = 11 : i64} {
  func.func @_bottleneck_kernel(%arg0: i32, %arg1: memref<16x32xf32, #tpu.memory_space<vmem>>, %arg2: memref<32x32xf32, #tpu.memory_space<vmem>>, %arg3: memref<1x32xf32, #tpu.memory_space<vmem>>, %arg4: memref<32x32xf32, #tpu.memory_space<vmem>>, %arg5: memref<1x32xf32, #tpu.memory_space<vmem>>, %arg6: memref<1x32xf32, #tpu.memory_space<vmem>>, %arg7: memref<1x32xf32, #tpu.memory_space<vmem>>, %arg8: memref<16x32xf32, #tpu.memory_space<vmem>>) attributes {dimension_semantics = [#tpu.dimension_semantics<parallel>], iteration_bounds = array<i64: 1>, scalar_prefetch = 0 : i64, scratch_operands = 0 : i64, tpu.core_type = #tpu.core_type<tc>, window_params = [{transform_indices = @transform_0, window_bounds = array<i64: 16, 32>}, {pipeline_mode = #tpu.pipeline_mode<synchronous>, transform_indices = @transform_1, window_bounds = array<i64: 32, 32>}, {pipeline_mode = #tpu.pipeline_mode<synchronous>, transform_indices = @transform_2, window_bounds = array<i64: 1, 32>}, {pipeline_mode = #tpu.pipeline_mode<synchronous>, transform_indices = @transform_3, window_bounds = array<i64: 32, 32>}, {pipeline_mode = #tpu.pipeline_mode<synchronous>, transform_indices = @transform_4, window_bounds = array<i64: 1, 32>}, {pipeline_mode = #tpu.pipeline_mode<synchronous>, transform_indices = @transform_5, window_bounds = array<i64: 1, 32>}, {pipeline_mode = #tpu.pipeline_mode<synchronous>, transform_indices = @transform_6, window_bounds = array<i64: 1, 32>}, {transform_indices = @transform_7, window_bounds = array<i64: 16, 32>}]} {
    %c0 = arith.constant 0 : index
    %c0_0 = arith.constant 0 : index
    %0 = vector.load %arg1[%c0, %c0_0] : memref<16x32xf32, #tpu.memory_space<vmem>>, vector<16x32xf32>
    %c0_1 = arith.constant 0 : index
    %c0_2 = arith.constant 0 : index
    %1 = vector.load %arg2[%c0_1, %c0_2] : memref<32x32xf32, #tpu.memory_space<vmem>>, vector<32x32xf32>
    %cst = arith.constant dense<0.000000e+00> : vector<16x32xf32>
    %2 = tpu.matmul %0, %1, %cst {dimension_numbers = #tpu.dot_dimension_numbers<[1], [0], [0], [1], [0, 0, 1, 1], [], []>} : vector<16x32xf32>, vector<32x32xf32>, vector<16x32xf32> -> vector<16x32xf32>
    %c0_3 = arith.constant 0 : index
    %c0_4 = arith.constant 0 : index
    %3 = vector.load %arg3[%c0_3, %c0_4] : memref<1x32xf32, #tpu.memory_space<vmem>>, vector<1x32xf32>
    %4 = vector.broadcast %3 : vector<1x32xf32> to vector<16x32xf32>
    %5 = arith.addf %2, %4 : vector<16x32xf32>
    %cst_5 = arith.constant 0.000000e+00 : f32
    %6 = vector.broadcast %cst_5 : f32 to vector<16x32xf32>
    %7 = arith.maximumf %5, %6 : vector<16x32xf32>
    %c0_6 = arith.constant 0 : index
    %c0_7 = arith.constant 0 : index
    %8 = vector.load %arg4[%c0_6, %c0_7] : memref<32x32xf32, #tpu.memory_space<vmem>>, vector<32x32xf32>
    %cst_8 = arith.constant dense<0.000000e+00> : vector<16x32xf32>
    %9 = tpu.matmul %7, %8, %cst_8 {dimension_numbers = #tpu.dot_dimension_numbers<[1], [0], [0], [1], [0, 0, 1, 1], [], []>} : vector<16x32xf32>, vector<32x32xf32>, vector<16x32xf32> -> vector<16x32xf32>
    %c0_9 = arith.constant 0 : index
    %c0_10 = arith.constant 0 : index
    %10 = vector.load %arg5[%c0_9, %c0_10] : memref<1x32xf32, #tpu.memory_space<vmem>>, vector<1x32xf32>
    %11 = vector.broadcast %10 : vector<1x32xf32> to vector<16x32xf32>
    %12 = arith.addf %9, %11 : vector<16x32xf32>
    %c0_11 = arith.constant 0 : index
    %c0_12 = arith.constant 0 : index
    %13 = vector.load %arg1[%c0_11, %c0_12] : memref<16x32xf32, #tpu.memory_space<vmem>>, vector<16x32xf32>
    %14 = arith.addf %12, %13 : vector<16x32xf32>
    %cst_13 = arith.constant dense<0.000000e+00> : vector<16xf32>
    %15 = vector.multi_reduction <add>, %14, %cst_13 [1] : vector<16x32xf32> to vector<16xf32>
    %16 = vector.shape_cast %15 : vector<16xf32> to vector<16x1xf32>
    %cst_14 = arith.constant 3.125000e-02 : f32
    %17 = vector.broadcast %cst_14 : f32 to vector<16x1xf32>
    %18 = arith.mulf %16, %17 : vector<16x1xf32>
    %19 = vector.broadcast %18 : vector<16x1xf32> to vector<16x32xf32>
    %20 = arith.subf %14, %19 : vector<16x32xf32>
    %21 = arith.mulf %20, %20 : vector<16x32xf32>
    %cst_15 = arith.constant dense<0.000000e+00> : vector<16xf32>
    %22 = vector.multi_reduction <add>, %21, %cst_15 [1] : vector<16x32xf32> to vector<16xf32>
    %23 = vector.shape_cast %22 : vector<16xf32> to vector<16x1xf32>
    %cst_16 = arith.constant 3.125000e-02 : f32
    %24 = vector.broadcast %cst_16 : f32 to vector<16x1xf32>
    %25 = arith.mulf %23, %24 : vector<16x1xf32>
    %cst_17 = arith.constant 9.99999974E-6 : f32
    %26 = vector.broadcast %cst_17 : f32 to vector<16x1xf32>
    %27 = arith.addf %25, %26 : vector<16x1xf32>
    %28 = math.rsqrt %27 : vector<16x1xf32>
    %c0_18 = arith.constant 0 : index
    %c0_19 = arith.constant 0 : index
    %29 = vector.load %arg6[%c0_18, %c0_19] : memref<1x32xf32, #tpu.memory_space<vmem>>, vector<1x32xf32>
    %30 = vector.broadcast %28 : vector<16x1xf32> to vector<16x32xf32>
    %31 = vector.broadcast %29 : vector<1x32xf32> to vector<16x32xf32>
    %32 = arith.mulf %30, %31 : vector<16x32xf32>
    %33 = arith.mulf %20, %32 : vector<16x32xf32>
    %c0_20 = arith.constant 0 : index
    %c0_21 = arith.constant 0 : index
    %34 = vector.load %arg7[%c0_20, %c0_21] : memref<1x32xf32, #tpu.memory_space<vmem>>, vector<1x32xf32>
    %35 = vector.broadcast %34 : vector<1x32xf32> to vector<16x32xf32>
    %36 = arith.addf %33, %35 : vector<16x32xf32>
    %c0_22 = arith.constant 0 : index
    %c0_23 = arith.constant 0 : index
    %37 = vector.load %arg8[%c0_22, %c0_23] : memref<16x32xf32, #tpu.memory_space<vmem>>, vector<16x32xf32>
    tpu.vector_store %arg8[%c0_22, %c0_23], %36 {strides = array<i32>} : memref<16x32xf32, #tpu.memory_space<vmem>>, vector<16x32xf32>,
    return
  }
  func.func @transform_0(%arg0: i32) -> (i32, i32) {
    %c0_i32 = arith.constant 0 : i32
    %c0_i32_0 = arith.constant 0 : i32
    return %arg0, %c0_i32 : i32, i32
  }
  func.func @transform_1(%arg0: i32) -> (i32, i32) {
    %c0_i32 = arith.constant 0 : i32
    %c0_i32_0 = arith.constant 0 : i32
    %c0_i32_1 = arith.constant 0 : i32
    return %c0_i32, %c0_i32_0 : i32, i32
  }
  func.func @transform_2(%arg0: i32) -> (i32, i32) {
    %c0_i32 = arith.constant 0 : i32
    %c0_i32_0 = arith.constant 0 : i32
    %c0_i32_1 = arith.constant 0 : i32
    return %c0_i32, %c0_i32_0 : i32, i32
  }
  func.func @transform_3(%arg0: i32) -> (i32, i32) {
    %c0_i32 = arith.constant 0 : i32
    %c0_i32_0 = arith.constant 0 : i32
    %c0_i32_1 = arith.constant 0 : i32
    return %c0_i32, %c0_i32_0 : i32, i32
  }
  func.func @transform_4(%arg0: i32) -> (i32, i32) {
    %c0_i32 = arith.constant 0 : i32
    %c0_i32_0 = arith.constant 0 : i32
    %c0_i32_1 = arith.constant 0 : i32
    return %c0_i32, %c0_i32_0 : i32, i32
  }
  func.func @transform_5(%arg0: i32) -> (i32, i32) {
    %c0_i32 = arith.constant 0 : i32
    %c0_i32_0 = arith.constant 0 : i32
    %c0_i32_1 = arith.constant 0 : i32
    return %c0_i32, %c0_i32_0 : i32, i32
  }
  func.func @transform_6(%arg0: i32) -> (i32, i32) {
    %c0_i32 = arith.constant 0 : i32
    %c0_i32_0 = arith.constant 0 : i32
    %c0_i32_1 = arith.constant 0 : i32
    return %c0_i32, %c0_i32_0 : i32, i32
  }
  func.func @transform_7(%arg0: i32) -> (i32, i32) {
    %c0_i32 = arith.constant 0 : i32
    %c0_i32_0 = arith.constant 0 : i32
    return %arg0, %c0_i32 : i32, i32
  }
}

</mosaic_0001>

<bundles_post_ra>
// kernel: shuffle_bottleneck_v2_residual.1
= control target key start
LH: loop header
LB: loop body
LE: loop exit
PB: predicated region body
PF: predicated region fallthrough
CT: control target
= control target key end

     0   :  { %12 = vsyncpa [#allocation3], 0  ;;  %s453_s0 = inlined_call_operand.hbm [shape: f32[16,32], index: 0, kind: input, shape index: {}]   ;;  %s454_s1 = inlined_call_operand.hbm [shape: f32[32,32], index: 1, kind: input, shape index: {}]   ;;  %s455_s2 = inlined_call_operand.vmem [shape: f32[1,32], index: 2, kind: input, shape index: {}]   ;;  %s456_s3 = inlined_call_operand.hbm [shape: f32[32,32], index: 3, kind: input, shape index: {}]   ;;  %s457_s4 = inlined_call_operand.vmem [shape: f32[1,32], index: 4, kind: input, shape index: {}]   ;;  %s458_s5 = inlined_call_operand.vmem [shape: f32[1,32], index: 5, kind: input, shape index: {}]   ;;  %s459_s6 = inlined_call_operand.vmem [shape: f32[1,32], index: 6, kind: input, shape index: {}]   ;;  %s460_s7 = inlined_call_operand.hbm [shape: f32[16,32], index: 7, kind: output, shape index: {}]  }
   0x1   :  { %13 = vsyncpa [#allocation6], 0 }
   0x2   :  { %14 = vsyncpa [#allocation4], 0  ;;  %s32_s26 = sshll.u32 %s454_s1, 4  ;;  %s361_s27 = smov [#allocation5]   ;;  %s33_s26 = int_to_ptr.hbm [resolvable:$true] %s32_s26 }
   0x3   :  { %s34_s28 = sshll.u32 %s361_s27, 4  ;;  %s19_s8 = sshll.u32 %s453_s0, 4  ;;  %s35_s28 = int_to_ptr.vmem [resolvable:$true] %s34_s28  ;;  %s20_s8 = int_to_ptr.hbm [resolvable:$true] %s19_s8 }
   0x4   :  { %s362_s9 = smov 128   ;;  %s363_s10 = smov 8  }
   0x5   :  { %40 = dma.hbm_to_vmem [thread:$0]  %s33_s26, 512, %s35_s28, [#allocation6], %s362_s9, %s362_s9, %s363_s10  }
   0x6   :  { %s364_s11 = smov [#allocation2]   ;;  %s47_s1 = sshll.u32 %s456_s3, 4  ;;  %s48_s1 = int_to_ptr.hbm [resolvable:$true] %s47_s1 }
   0x7   :  { %s21_s12 = sshll.u32 %s364_s11, 4  ;;  %s365_s0 = smov [#allocation7]   ;;  %s22_s12 = int_to_ptr.vmem [resolvable:$true] %s21_s12 }
   0x8   :  { %27 = dma.hbm_to_vmem [thread:$0]  %s20_s8, 256, %s22_s12, [#allocation3], %s362_s9, %s362_s9, %s363_s10  }
   0x9   :  { %s49_s15 = sshll.u32 %s365_s0, 4  ;;  %s50_s15 = int_to_ptr.vmem [resolvable:$true] %s49_s15 }
   0xa   :  { %55 = dma.hbm_to_vmem [thread:$0]  %s48_s1, 512, %s50_s15, [#allocation6], %s362_s9, %s362_s9, %s363_s10  }
   0xb   :  { %355 = dma.done.wait [#allocation3], 256  }
   0xc   :  { %356 = vsyncadd [#allocation3], 4294967040 }
   0xd   :  { %357 = dma.done.wait [#allocation6], 1024  }
   0xe   :  { %358 = vsyncadd [#allocation6], 4294966272  ;;  %v79_v0 = vld [vmem:[#allocation5 + $0x18] sm:$0xff]  ;;  %v78_v1 = vld [vmem:[#allocation5 + $0x10] sm:$0xff]  ;;  %vm84_vm0 = vcmask 261120  }
   0xf   :  { %103 = vmatpush.msra.mxu0 %v79_v0  ;;  %237 = vmatpush.msra.mxu2 %v79_v0  ;;  %v77_v2 = vld [vmem:[#allocation5 + $0x8] sm:$0xff]  ;;  %v119_v3 = vld [vmem:[#allocation7 + $0x18] sm:$0xff]  ;;  %v76_v4 = vld [vmem:[#allocation5] sm:$0xff] }
  0x10   :  { %142 = vmatpush.msra.mxu1 %v119_v3  ;;  %241 = vmatpush.msra.mxu3 %v119_v3  ;;  %v74_v5 = vld [vmem:[#allocation2] sm:$0xff]  ;;  %v75_v6 = vld [vmem:[#allocation2 + $0x8] sm:$0xff]  ;;  %v117_v8 = vld [vmem:[#allocation7 + $0x8] sm:$0xff] }
  0x11   :  { %104 = vmatpush.msra.mxu0 %v78_v1  ;;  %238 = vmatpush.msra.mxu2 %v78_v1  ;;  %v118_v7 = vld [vmem:[#allocation7 + $0x10] sm:$0xff]  ;;  %v116_v9 = vld [vmem:[#allocation7] sm:$0xff] }
  0x12   :  { %143 = vmatpush.msra.mxu1 %v118_v7  ;;  %242 = vmatpush.msra.mxu3 %v118_v7  ;;  %v251_v10 = vld [vmem:[%s455_s2] ss:$0 sm:$0xff] }
  0x13   :  { %105 = vmatpush.msra.mxu0 %v77_v2  ;;  %239 = vmatpush.msra.mxu2 %v77_v2  ;;  %v252_v17 = vld [vmem:[%s457_s4] ss:$0 sm:$0xff] }
  0x14   :  { %144 = vmatpush.msra.mxu1 %v117_v8  ;;  %243 = vmatpush.msra.mxu3 %v117_v8  ;;  %v253_v47 = vld [vmem:[%s458_s5] ss:$0 sm:$0xff]  ;;  %s366_s5 = smov [#allocation8]  }
  0x15   :  { %106 = vmatpush.msra.mxu0 %v76_v4  ;;  %240 = vmatpush.msra.mxu2 %v76_v4  ;;  %v254_v52 = vld [vmem:[%s459_s6] ss:$0 sm:$0xff]  ;;  %s217_s21 = sshll.u32 %s366_s5, 4  ;;  %s219_s6 = sshll.u32 %s460_s7, 4  ;;  %s218_s21 = int_to_ptr.vmem [resolvable:$true] %s217_s21  ;;  %s220_s6 = int_to_ptr.hbm [resolvable:$true] %s219_s6 }
  0x16   :  { %233 = vmatmul.msk.f32.vlgmr.msra.gmra.mxu0 %vm84_vm0, %v74_v5  ;;  %234 = vmatmul.msk.f32.vlgmr.msra.gmra.mxu2 %vm84_vm0, %v75_v6 }
  0x17   :  { %145 = vmatpush.msra.mxu1 %v116_v9  ;;  %244 = vmatpush.msra.mxu3 %v116_v9 }
  0x93   :  { %v108_v11 = vpop.f32.mrf.mxu0 }
  0x94   :  { %v109_v12 = vadd.f32 %v251_v10, %v108_v11 }
  0x96   :  { %v114_v13 = vmax.f32 %v109_v12, 0.0 }
  0x98   :  { %235 = vmatmul.msk.f32.vlgmr.msra.gmra.mxu1 %vm84_vm0, %v114_v13 }
  0x99   :  { %v111_v14 = vpop.f32.mrf.mxu2 }
  0x9a   :  { %v112_v15 = vadd.f32 %v251_v10, %v111_v14 }
  0x9c   :  { %v115_v16 = vmax.f32 %v112_v15, 0.0 }
  0x9e   :  { %236 = vmatmul.msk.f32.vlgmr.msra.gmra.mxu3 %vm84_vm0, %v115_v16 }
 0x115   :  { %v147_v18 = vpop.f32.mrf.mxu1 }
 0x116   :  { %v148_v19 = vadd.f32 %v252_v17, %v147_v18 }
 0x118   :  { %v153_v20 = vadd.f32 %v148_v19, %v74_v5 }
 0x11a   :  { %v155_v21 = vsel %vm84_vm0, %v153_v20, 0.0 }
 0x11b   :  { %156 = vadd.xlane.f32.xlu0 %v155_v21 }
 0x121   :  { %v150_v22 = vpop.f32.mrf.mxu3 }
 0x122   :  { %v151_v23 = vadd.f32 %v252_v17, %v150_v22 }
 0x124   :  { %v154_v24 = vadd.f32 %v151_v23, %v75_v6 }
 0x126   :  { %v158_v25 = vsel %vm84_vm0, %v154_v24, 0.0 }
 0x127   :  { %159 = vadd.xlane.f32.xlu0 %v158_v25 }
 0x18e   :  { %v157_v26 = vpop.xlane.xlu0 %156 }
 0x18f   :  { %v161_v27 = vmul.f32 0.03125, %v157_v26 }
 0x191   :  { %v163_v28 = vsub.f32 %v153_v20, %v161_v27 }
 0x193   :  { %v165_v29 = vmul.f32 %v163_v28, %v163_v28 }
 0x195   :  { %v167_v30 = vsel %vm84_vm0, %v165_v29, 0.0 }
 0x196   :  { %168 = vadd.xlane.f32.xlu1 %v167_v30 }
 0x19a   :  { %v160_v31 = vpop.xlane.xlu0 %159 }
 0x19b   :  { %v162_v32 = vmul.f32 0.03125, %v160_v31 }
 0x19d   :  { %v164_v33 = vsub.f32 %v154_v24, %v162_v32 }
 0x19f   :  { %v166_v34 = vmul.f32 %v164_v33, %v164_v33 }
 0x1a1   :  { %v170_v35 = vsel %vm84_vm0, %v166_v34, 0.0 }
 0x1a2   :  { %171 = vadd.xlane.f32.xlu1 %v170_v35 }
 0x209   :  { %v169_v36 = vpop.xlane.xlu1 %168 }
 0x20a   :  { %v173_v37 = vmul.f32 0.03125, %v169_v36 }
 0x20c   :  { %v175_v38 = vadd.f32 1e-05, %v173_v37 }
 0x20e   :  { %255 = vrsqrt.f32 %v175_v38  ;;  %vm183_vm2 = vweird.f32 %v175_v38 }
 0x214   :  { %v256_v39 = vpop.eup %255 }
 0x215   :  { %v178_v40 = vmul.f32 %v256_v39, %v175_v38  ;;  %v172_v41 = vpop.xlane.xlu1 %171  ;;  %vm184_vm1 = vweird.f32 %v256_v39 }
 0x216   :  { %v174_v42 = vmul.f32 0.03125, %v172_v41  ;;  %vm185_vm3 = vmor %vm183_vm2, %vm184_vm1 }
 0x217   :  { %v179_v43 = vmul.f32 %v256_v39, %v178_v40 }
 0x218   :  { %v176_v44 = vadd.f32 1e-05, %v174_v42 }
 0x219   :  { %v180_v45 = vmul.f32 0.5, %v179_v43 }
 0x21a   :  { %257 = vrsqrt.f32 %v176_v44  ;;  %vm193_vm5 = vweird.f32 %v176_v44 }
 0x21b   :  { %v181_v46 = vsub.f32 1.5, %v180_v45 }
 0x21d   :  { %v182_v48 = vmul.f32 %v256_v39, %v181_v46 }
 0x21f   :  { %v186_v49 = vsel %vm185_vm3, %v256_v39, %v182_v48 }
 0x220   :  { %v258_v50 = vpop.eup %257  ;;  %v201_v51 = vmul.f32 %v253_v47, %v186_v49 }
 0x221   :  { %v188_v53 = vmul.f32 %v258_v50, %v176_v44  ;;  %vm194_vm4 = vweird.f32 %v258_v50 }
 0x222   :  { %v203_v54 = vmul.f32 %v201_v51, %v163_v28  ;;  %vm195_vm6 = vmor %vm193_vm5, %vm194_vm4 }
 0x223   :  { %v189_v55 = vmul.f32 %v258_v50, %v188_v53 }
 0x224   :  { %v209_v56 = vadd.f32 %v254_v52, %v203_v54 }
 0x225   :  { %v190_v57 = vmul.f32 0.5, %v189_v55 }
 0x226   :  { %211 = vst.msk [vmem:[#allocation8] sm:$0xff] %vm84_vm0, %v209_v56 }
 0x227   :  { %v191_v58 = vsub.f32 1.5, %v190_v57 }
 0x229   :  { %v192_v59 = vmul.f32 %v258_v50, %v191_v58 }
 0x22b   :  { %v196_v60 = vsel %vm195_vm6, %v258_v50, %v192_v59 }
 0x22c   :  { %v202_v61 = vmul.f32 %v253_v47, %v196_v60 }
 0x22e   :  { %v204_v62 = vmul.f32 %v202_v61, %v164_v33 }
 0x230   :  { %v210_v63 = vadd.f32 %v254_v52, %v204_v62 }
 0x232   :  { %212 = vst.msk [vmem:[#allocation8 + $0x8] sm:$0xff] %vm84_vm0, %v210_v63 }
 0x233   :  { %225 = dma.vmem_to_hbm [thread:$0]  %s218_s21, 256, %s220_s6, [#allocation4], %s362_s9, %s362_s9, %s363_s10  }
 0x234   :  { %359 = dma.done.wait [#allocation4], 256  }
 0x235   :  { %360 = vsyncadd [#allocation4], 4294967040 }
 0x236   :  { %230 = vsyncpa [#allocation3], 1 }
 0x237   :  { %231 = vsyncpa [#allocation6], 1 }
 0x238   :  { %232 = vsyncpa [#allocation4], 1 }

</bundles_post_ra>
